<compile_context>
chip_gen: v7x
topology: tpu7x:2x2x1
jax: 0.10.0
libtpu: 0.0.40
codegen_flags: <defaults>
</compile_context>

<pallas_src>
import math

import jax
import jax.numpy as jnp
from jax.experimental import pallas as pl
from jax.experimental.pallas import tpu as pltpu


def _round_up(a, b):
    return (a + b - 1) // b * b


# ----------------------------- Pallas kernel ------------------------------ #
def patch_embed_kernel(x_ref, w_ref, pe_ref, out_ref):
    # x_ref:   (TB, seq_len)               raw rows, time on the lane axis
    # w_ref:   (seq_len, n_patches*d_model) combined unfold+pad+linear weight
    # pe_ref:  (1, n_patches*d_model)       flattened sinusoidal PE (row bias)
    # out_ref: (TB, n_patches*d_model)      lane-dense flattened output
    y = jnp.dot(x_ref[...], w_ref[...], preferred_element_type=jnp.float32)
    y = y + pe_ref[...]                    # broadcast over rows (VPU)
    out_ref[...] = y.astype(out_ref.dtype)  # single unmasked full-width store


# ------------------------------- wrapper ----------------------------------- #
def build_combined_weight(w_t, seq_len, patch_len, stride, n_patches):
    """Fold unfold + replication pad + Linear(patch_len, d_model) into one
    (seq_len, n_patches*d_model) matrix (computed once, tiny XLA op)."""
    d_model = w_t.shape[1]
    t = jnp.arange(seq_len)[:, None, None]                    # (T,1,1)
    p = jnp.arange(n_patches)[None, :, None]                  # (1,P,1)
    k = jnp.arange(patch_len)[None, None, :]                  # (1,1,K)
    # Replication pad: any patch position >= seq_len reads x[:, seq_len-1].
    src = jnp.minimum(p * stride + k, seq_len - 1)            # (1,P,K)
    scatter = (t == src).astype(w_t.dtype)                    # (T,P,K)
    w_big = jnp.einsum("tpk,kd->tpd", scatter, w_t)           # (T,P,D)
    return w_big.reshape(seq_len, n_patches * d_model)


def patch_embedding_forward(x, w_t, pe, patch_len, stride, padding):
    """x: (B, n_vars, seq_len) -> (B * n_vars, n_patches, d_model)."""
    B, n_vars, seq_len = x.shape
    d_model = w_t.shape[1]
    n_patches = (seq_len + padding - patch_len) // stride + 1
    NC = n_patches * d_model
    BN = B * n_vars

    x2d = x.reshape(BN, seq_len)            # free reshape; time stays on lanes
    w_big = build_combined_weight(w_t, seq_len, patch_len, stride, n_patches)
    pe_flat = pe.reshape(1, NC)

    # Row-tile size: keep (x tile + out tile) double-buffered plus the resident
    # weight/PE blocks under ~12 MiB so it fits every generation's default
    # scoped-VMEM limit (v5e 16 MiB, v6e/v7x 32 MiB).
    budget = 12 * 1024 * 1024
    fixed = 2 * 4 * (seq_len * NC + NC)              # W_big + PE (f32, 2 bufs)
    per_row = 2 * 4 * (seq_len + NC)                 # x row + out row, 2 bufs
    tb_cap = max(8, (budget - fixed) // max(per_row, 1))
    TB = max(8, (min(1024, tb_cap) // 8) * 8)
    TB = min(TB, _round_up(BN, 8))
    BN_pad = _round_up(BN, TB)
    if BN_pad != BN:
        x2d = jnp.pad(x2d, ((0, BN_pad - BN), (0, 0)))

    out_flat = pl.pallas_call(
        patch_embed_kernel,
        out_shape=jax.ShapeDtypeStruct((BN_pad, NC), x.dtype),
        grid=(BN_pad // TB,),
        in_specs=[
            pl.BlockSpec((TB, seq_len), lambda i: (i, 0)),
            pl.BlockSpec((seq_len, NC), lambda i: (0, 0)),   # constant block: DMA'd once
            pl.BlockSpec((1, NC), lambda i: (0, 0)),
        ],
        out_specs=pl.BlockSpec((TB, NC), lambda i: (i, 0)),
        compiler_params=pltpu.CompilerParams(
            dimension_semantics=("parallel",)),
    )(x2d, w_big, pe_flat)

    out = out_flat[:BN].reshape(BN, n_patches, d_model)
    # TODO(synk): training-mode (stochastic) dropout not implemented; eval-mode
    # dropout is identity, matching this deterministic forward.
    return out


def make_positional_encoding(n_positions, d_model, dtype=jnp.float32):
    """Sinusoidal PE table identical to pypots PositionalEncoding."""
    position = jnp.arange(n_positions, dtype=jnp.float32)[:, None]
    div_term = jnp.exp(jnp.arange(0, d_model, 2, dtype=jnp.float32)
                       * -(math.log(10000.0) / d_model))
    angles = position * div_term[None, :]                     # (n_positions, d_model//2)
    pe = jnp.zeros((n_positions, d_model), dtype=jnp.float32)
    pe = pe.at[:, 0::2].set(jnp.sin(angles))
    pe = pe.at[:, 1::2].set(jnp.cos(angles))
    return pe.astype(dtype)


# ------------------------------- reference -------------------------------- #
def reference_forward(x, w_t, pe, patch_len, stride, padding):
    B, n_vars, seq_len = x.shape
    pad_block = jnp.repeat(x[..., -1:], padding, axis=-1)
    x_pad = jnp.concatenate([x, pad_block], axis=-1)
    n_patches = (seq_len + padding - patch_len) // stride + 1
    idx = (jnp.arange(n_patches)[:, None] * stride
           + jnp.arange(patch_len)[None, :])
    patches = x_pad[..., idx].reshape(B * n_vars, n_patches, patch_len)
    return jnp.einsum("bpl,ld->bpd", patches, w_t) + pe[None, :, :]


if __name__ == "__main__":
    # Module hyperparameters (small, consistent with PatchTST defaults)
    d_model = 32
    patch_len = 8
    stride = 4
    padding = 4          # = stride, as PatchTST typically uses
    dropout = 0.0        # eval mode -> identity

    # Input: (batch=2, n_vars=4, seq_len=16)
    B, n_vars, seq_len = 2, 4, 16
    key = jax.random.PRNGKey(0)
    kx, kw = jax.random.split(key)
    x = jax.random.normal(kx, (B, n_vars, seq_len), dtype=jnp.float32)

    # value_embedding: nn.Linear(patch_len, d_model, bias=False); store W^T.
    bound = 1.0 / math.sqrt(patch_len)
    w_t = jax.random.uniform(kw, (patch_len, d_model), dtype=jnp.float32,
                             minval=-bound, maxval=bound)

    n_patches = (seq_len + padding - patch_len) // stride + 1
    pe = make_positional_encoding(n_patches, d_model)

    out = patch_embedding_forward(x, w_t, pe, patch_len, stride, padding)
    out = jax.block_until_ready(out)

    ref = reference_forward(x, w_t, pe, patch_len, stride, padding)
    assert out.shape == (B * n_vars, n_patches, d_model)
    assert jnp.allclose(out, ref, atol=1e-5, rtol=1e-5)
    print("KERNEL_OK")
</pallas_src>

<mosaic_0001>
module attributes {stable_mosaic.version = 11 : i64} {
  func.func @patch_embed_kernel(%arg0: i32, %arg1: memref<8x16xf32, #tpu.memory_space<vmem>>, %arg2: memref<16x128xf32, #tpu.memory_space<vmem>>, %arg3: memref<1x128xf32, #tpu.memory_space<vmem>>, %arg4: memref<8x128xf32, #tpu.memory_space<vmem>>) attributes {dimension_semantics = [#tpu.dimension_semantics<parallel>], iteration_bounds = array<i64: 1>, scalar_prefetch = 0 : i64, scratch_operands = 0 : i64, tpu.core_type = #tpu.core_type<tc>, window_params = [{transform_indices = @transform_0, window_bounds = array<i64: 8, 16>}, {pipeline_mode = #tpu.pipeline_mode<synchronous>, transform_indices = @transform_1, window_bounds = array<i64: 16, 128>}, {pipeline_mode = #tpu.pipeline_mode<synchronous>, transform_indices = @transform_2, window_bounds = array<i64: 1, 128>}, {transform_indices = @transform_3, window_bounds = array<i64: 8, 128>}]} {
    %c0 = arith.constant 0 : index
    %c0_0 = arith.constant 0 : index
    %0 = vector.load %arg1[%c0, %c0_0] : memref<8x16xf32, #tpu.memory_space<vmem>>, vector<8x16xf32>
    %c0_1 = arith.constant 0 : index
    %c0_2 = arith.constant 0 : index
    %1 = vector.load %arg2[%c0_1, %c0_2] : memref<16x128xf32, #tpu.memory_space<vmem>>, vector<16x128xf32>
    %cst = arith.constant dense<0.000000e+00> : vector<8x128xf32>
    %2 = tpu.matmul %0, %1, %cst {dimension_numbers = #tpu.dot_dimension_numbers<[1], [0], [0], [1], [0, 0, 1, 1], [], []>} : vector<8x16xf32>, vector<16x128xf32>, vector<8x128xf32> -> vector<8x128xf32>
    %c0_3 = arith.constant 0 : index
    %c0_4 = arith.constant 0 : index
    %3 = vector.load %arg3[%c0_3, %c0_4] : memref<1x128xf32, #tpu.memory_space<vmem>>, vector<1x128xf32>
    %4 = vector.broadcast %3 : vector<1x128xf32> to vector<8x128xf32>
    %5 = arith.addf %2, %4 : vector<8x128xf32>
    %c0_5 = arith.constant 0 : index
    %c0_6 = arith.constant 0 : index
    %6 = vector.load %arg4[%c0_5, %c0_6] : memref<8x128xf32, #tpu.memory_space<vmem>>, vector<8x128xf32>
    tpu.vector_store %arg4[%c0_5, %c0_6], %5 {strides = array<i32>} : memref<8x128xf32, #tpu.memory_space<vmem>>, vector<8x128xf32>,
    return
  }
  func.func @transform_0(%arg0: i32) -> (i32, i32) {
    %c0_i32 = arith.constant 0 : i32
    %c0_i32_0 = arith.constant 0 : i32
    return %arg0, %c0_i32 : i32, i32
  }
  func.func @transform_1(%arg0: i32) -> (i32, i32) {
    %c0_i32 = arith.constant 0 : i32
    %c0_i32_0 = arith.constant 0 : i32
    %c0_i32_1 = arith.constant 0 : i32
    return %c0_i32, %c0_i32_0 : i32, i32
  }
  func.func @transform_2(%arg0: i32) -> (i32, i32) {
    %c0_i32 = arith.constant 0 : i32
    %c0_i32_0 = arith.constant 0 : i32
    %c0_i32_1 = arith.constant 0 : i32
    return %c0_i32, %c0_i32_0 : i32, i32
  }
  func.func @transform_3(%arg0: i32) -> (i32, i32) {
    %c0_i32 = arith.constant 0 : i32
    %c0_i32_0 = arith.constant 0 : i32
    return %arg0, %c0_i32 : i32, i32
  }
}

</mosaic_0001>

<bundles_post_ra>
// kernel: tpu_custom_call.1
= control target key start
LH: loop header
LB: loop body
LE: loop exit
PB: predicated region body
PF: predicated region fallthrough
CT: control target
= control target key end

     0   :  { %8 = vsyncpa [#allocation3], 0  ;;  %s311_s0 = inlined_call_operand.hbm [shape: f32[8,16], index: 0, kind: input, shape index: {}]   ;;  %s312_s1 = inlined_call_operand.hbm [shape: f32[16,128], index: 1, kind: input, shape index: {}]   ;;  %s313_s2 = inlined_call_operand.vmem [shape: f32[1,128], index: 2, kind: input, shape index: {}]   ;;  %s314_s3 = inlined_call_operand.hbm [shape: f32[8,128], index: 3, kind: output, shape index: {}]  }
   0x1   :  { %9 = vsyncpa [#allocation6], 0 }
   0x2   :  { %10 = vsyncpa [#allocation4], 0  ;;  %s237_s12 = smov [#allocation2]   ;;  %s238_s14 = smov [#allocation5]  }
   0x3   :  { %s17_s13 = sshll.u32 %s237_s12, 4  ;;  %s26_s15 = sshll.u32 %s238_s14, 4  ;;  %s18_s13 = int_to_ptr.vmem [resolvable:$true] %s17_s13  ;;  %s265_s15 = int_to_ptr.vmem [resolvable:$true] %s26_s15 }
   0x4   :  { %s165_s18 = scalar_lea.hbm %s311_s0, 128 }
   0x5   :  { %p166_p0 = scmp.ne.s32.totalorder %s311_s0, %s165_s18  ;;  %p169_p1 = scmp.lt.u32.totalorder %s165_s18, %s311_s0 }
   0x7   :  { %p171_p2 = pnand %p169_p1, %p166_p0 }
   0x9   :  { %174 = shalt.err (!%p171_p2)
}
   0xa   :  { %s175_s23 = scalar_lea.vmem %s18_s13, 128  ;;  %p180_p4 = scmp.lt.s32.totalorder %s18_s13, %s18_s13 }
   0xb   :  { %p176_p3 = scmp.ne.s32.totalorder %s18_s13, %s175_s23  ;;  %p181_p5 = scmp.lt.s32.totalorder %s175_s23, %s175_s23 }
   0xd   :  { %p182_p6 = por %p181_p5, %p180_p4 }
   0xf   :  { %p183_p7 = pnand %p182_p6, %p176_p3 }
  0x11   :  { %186 = shalt.err (!%p183_p7)
}
  0x12   :  { %20 = dma.hbm_to_vmem [thread:$0]  %s311_s0, 128, %s18_s13, [#allocation3]  }
  0x13   :  { %s187_s28 = scalar_lea.hbm %s312_s1, 256 }
  0x14   :  { %p188_p8 = scmp.ne.s32.totalorder %s312_s1, %s187_s28  ;;  %p191_p9 = scmp.lt.u32.totalorder %s187_s28, %s312_s1 }
  0x16   :  { %p193_p10 = pnand %p191_p9, %p188_p8 }
  0x18   :  { %196 = shalt.err (!%p193_p10)
}
  0x19   :  { %s197_s6 = scalar_lea.vmem %s265_s15, 256  ;;  %p202_p12 = scmp.lt.s32.totalorder %s265_s15, %s265_s15 }
  0x1a   :  { %p198_p11 = scmp.ne.s32.totalorder %s265_s15, %s197_s6  ;;  %p203_p13 = scmp.lt.s32.totalorder %s197_s6, %s197_s6 }
  0x1c   :  { %p204_p0 = por %p203_p13, %p202_p12 }
  0x1e   :  { %p205_p1 = pnand %p204_p0, %p198_p11 }
  0x20   :  { %208 = shalt.err (!%p205_p1)
}
  0x21   :  { %s239_s0 = smov 128   ;;  %s240_s7 = smov 8  }
  0x22   :  { %32 = dma.hbm_to_vmem [thread:$0]  %s312_s1, 256, %s265_s15, [#allocation6], %s239_s0, %s239_s0, %s240_s7  }
  0x23   :  { %231 = dma.done.wait [#allocation3], 128  }
  0x24   :  { %232 = vsyncadd [#allocation3], 4294967168 }
  0x25   :  { %233 = dma.done.wait [#allocation6], 256  }
  0x26   :  { %234 = vsyncadd [#allocation6], 4294967040  ;;  %v241_v0 = vmov 0.0|0.0   ;;  %vm242_vm0 = vmmov 0   ;;  %v243_v1 = vmov 0.0   ;;  %v42_v2 = vld [vmem:[#allocation5] sm:$0xff] }
  0x27   :  { %154 = vmatprep.subr.bf16.mxu0 %v241_v0  ;;  %151 = vmatprep.mubr.msk.f32.mxu0 %vm242_vm0, %v243_v1  ;;  %v43_v3 = vld [vmem:[#allocation5 + $0x8] sm:$0xff]  ;;  %v41_v5 = vld [vmem:[#allocation2] sm:$0xff]  ;;  %vm51_vm1 = vcmask 130048   ;;  %s244_s1 = smov [#allocation7]  }
  0x28   :  { %v155_v4 = vpack.c.bf16 %v43_v3, %v42_v2  ;;  %v142_v6 = vld [vmem:[%s313_s2] ss:$0 sm:$0xff]  ;;  %s132_s12 = sshll.u32 %s244_s1, 4  ;;  %s133_s12 = int_to_ptr.vmem [resolvable:$true] %s132_s12 }
  0x29   :  { %s209_s13 = scalar_lea.vmem %s133_s12, 128  ;;  %p214_p3 = scmp.lt.s32.totalorder %s133_s12, %s133_s12 }
  0x2a   :  { %156 = vmatpush3.bf16.msra.mxu0 %v155_v4  ;;  %p210_p2 = scmp.ne.s32.totalorder %s133_s12, %s209_s13  ;;  %p215_p4 = scmp.lt.s32.totalorder %s209_s13, %s209_s13 }
  0x2c   :  { %p216_p5 = por %p215_p4, %p214_p3 }
  0x2d   :  { %152 = vmatmul.mubr.msk.f32.vlgmr.msra.gmra.mrb[0].mxu0 %vm51_vm1, %v41_v5 }
  0x2e   :  { %p217_p6 = pnand %p216_p5, %p210_p2 }
 0x100   :  { %v121_v7 = vpop.f32.mrb[0].mxu0 }
 0x101   :  { %v122_v8 = vadd.f32 %v142_v6, %v121_v7  ;;  %v153_v9 = vpop.f32.mrb[1].mxu0 }
 0x103   :  { %125 = vst [vmem:[#allocation7] sm:$0xff] %v122_v8 }
 0x104   :  { %220 = shalt.err (!%p217_p6)
}
 0x105   :  { %s221_s16 = scalar_lea.hbm %s314_s3, 128 }
 0x106   :  { %p222_p7 = scmp.ne.s32.totalorder %s314_s3, %s221_s16  ;;  %p225_p8 = scmp.lt.u32.totalorder %s221_s16, %s314_s3 }
 0x108   :  { %p227_p9 = pnand %p225_p8, %p222_p7 }
 0x10a   :  { %230 = shalt.err (!%p227_p9)
}
 0x10b   :  { %135 = dma.vmem_to_hbm [thread:$0]  %s133_s12, 128, %s314_s3, [#allocation4]  }
 0x10c   :  { %235 = dma.done.wait [#allocation4], 128  }
 0x10d   :  { %236 = vsyncadd [#allocation4], 4294967168 }
 0x10e   :  { %139 = vsyncpa [#allocation3], 1 }
 0x10f   :  { %140 = vsyncpa [#allocation6], 1 }
 0x110   :  { %141 = vsyncpa [#allocation4], 1 }

</bundles_post_ra>
